<compile_context>
chip_gen: v7x
topology: tpu7x:2x2x1
jax: 0.10.0
libtpu: 0.0.40
codegen_flags: <defaults>
</compile_context>

<pallas_src>
import functools

import jax
import jax.numpy as jnp
from jax.experimental import pallas as pl
from jax.experimental.pallas import tpu as pltpu

LANE = 128  # TPU lane width; pad every lane (last) dim to a multiple of this.


def _round_up(v, m):
    return ((v + m - 1) // m) * m


def _pad2d(x, rows, cols):
    r, c = x.shape
    return jnp.pad(x, ((0, rows - r), (0, cols - c)))


def _row_tile(n_pad):
    """Largest row tile in {512, 256, 128} that divides n_pad and whose double-buffered
    bf16 A row slab (tm, n_pad) stays within ~24 MiB (safe on v7x's 64 MiB VMEM)."""
    budget = 24 << 20
    for t in (512, 256, 128):
        if n_pad % t == 0 and 2 * t * n_pad * 2 <= budget:
            return t
    return 128


def _vmem_limit(n_pad, f_pad, h_pad, c_pad, tm):
    """Scoped-VMEM request derived from actual padded block sizes, capped below physical VMEM."""
    bf, f32 = 2, 4
    call0 = 2 * (tm * f_pad * bf + f_pad * h_pad * bf + tm * h_pad * bf)
    call1 = 2 * (tm * n_pad * bf + n_pad * h_pad * bf + h_pad * f32
                 + h_pad * c_pad * bf + tm * c_pad * bf)
    call2 = 2 * (tm * n_pad * bf + n_pad * c_pad * bf + 2 * c_pad * f32 + tm * c_pad * f32)
    need = max(call0, call1, call2) + (8 << 20)  # headroom for Mosaic internal scratch
    try:
        cap = int(pltpu.get_tpu_info().vmem_capacity_bytes)
    except Exception:
        cap = 64 << 20  # conservative fallback: assume v7x (64 MiB physical per TC)
    return int(min(max(need, 32 << 20), (cap * 3) // 4))


# --------------------------------- kernels ---------------------------------

def xw_kernel(x_ref, w_ref, o_ref):
    """XW1 row tile: o = X_tile @ W1  (bf16 operands, f32 MXU accumulate, bf16 store)."""
    o_ref[...] = jnp.dot(
        x_ref[...], w_ref[...], preferred_element_type=jnp.float32
    ).astype(o_ref.dtype)


def layer1_kernel(a_ref, xw1_ref, b1_ref, w2_ref, o_ref):
    """Layer-1 aggregation + relu + layer-2 dense transform for one output row tile:
         o = relu(A_tile @ XW1 + b1) @ W2     (stored bf16)
    """
    h = jnp.dot(a_ref[...], xw1_ref[...], preferred_element_type=jnp.float32) + b1_ref[...]
    h = jnp.maximum(h, 0.0)
    # TODO(synk): dropout is identity (eval mode / training=False); train-mode dropout would use
    # pltpu.prng_seed + pltpu.prng_random_bits.
    o_ref[...] = jnp.dot(
        h.astype(jnp.bfloat16), w2_ref[...], preferred_element_type=jnp.float32
    ).astype(o_ref.dtype)


def layer2_kernel(a_ref, hw2_ref, b2_ref, cmask_ref, o_ref):
    """Layer-2 aggregation + masked log_softmax for one output row tile:
         z = A_tile @ HW2 + b2 + class_mask ;  o = log_softmax(z)
    cmask is 0 on real class lanes, -1e30 on zero-padded lanes, so the normalization
    only covers real classes.
    """
    z = jnp.dot(a_ref[...], hw2_ref[...], preferred_element_type=jnp.float32)
    z = z + b2_ref[...] + cmask_ref[...]
    m = jnp.max(z, axis=1, keepdims=True)
    s = z - m
    lse = jnp.log(jnp.sum(jnp.exp(s), axis=1, keepdims=True))
    o_ref[...] = s - lse


# --------------------------------- wrappers ---------------------------------

def prepare_gcn_params(a_hat, w1, b1, w2, b2):
    """Pad + bf16-cast the call-invariant operands ONCE (hoisted off the forward path)."""
    n = a_hat.shape[0]
    f, hidden = w1.shape
    c = w2.shape[1]
    n_pad, f_pad = _round_up(n, LANE), _round_up(f, LANE)
    h_pad, c_pad = _round_up(hidden, LANE), _round_up(c, LANE)
    bf16 = jnp.bfloat16
    cmask = jnp.where(jnp.arange(c_pad) < c, 0.0, -1e30).astype(jnp.float32)[None, :]
    return {
        "a": _pad2d(a_hat, n_pad, n_pad).astype(bf16),
        "w1": _pad2d(w1, f_pad, h_pad).astype(bf16),
        "b1": _pad2d(b1, 1, h_pad).astype(jnp.float32),
        "w2": _pad2d(w2, h_pad, c_pad).astype(bf16),
        "b2": _pad2d(b2, 1, c_pad).astype(jnp.float32),
        "cmask": cmask,
    }


@functools.partial(jax.jit, static_argnames=("num_classes",))
def gcn_forward(params, x, *, num_classes):
    n, _ = x.shape
    a, w1, b1 = params["a"], params["w1"], params["b1"]
    w2, b2, cmask = params["w2"], params["b2"], params["cmask"]

    n_pad = a.shape[0]
    f_pad, h_pad = w1.shape
    c_pad = w2.shape[1]

    tm = _row_tile(n_pad)
    grid = (n_pad // tm,)
    cparams = pltpu.CompilerParams(
        dimension_semantics=("parallel",),
        vmem_limit_bytes=_vmem_limit(n_pad, f_pad, h_pad, c_pad, tm),
    )

    # Only X needs per-call padding / casting.
    x_p = _pad2d(x, n_pad, f_pad).astype(jnp.bfloat16)

    # ---- call 0: XW1 = X @ W1  (dense transform first: H << F) ----
    xw1 = pl.pallas_call(
        xw_kernel,
        out_shape=jax.ShapeDtypeStruct((n_pad, h_pad), jnp.bfloat16),
        grid=grid,
        in_specs=[pl.BlockSpec((tm, f_pad), lambda i: (i, 0)),
                  pl.BlockSpec((f_pad, h_pad), lambda i: (0, 0))],
        out_specs=pl.BlockSpec((tm, h_pad), lambda i: (i, 0)),
        compiler_params=cparams,
        cost_estimate=pl.CostEstimate(
            flops=2 * n_pad * f_pad * h_pad,
            transcendentals=0,
            bytes_accessed=2 * (n_pad * f_pad + f_pad * h_pad + n_pad * h_pad)),
    )(x_p, w1)

    # ---- call 1: HW2 = relu(A_hat @ XW1 + b1) @ W2 ----
    hw2 = pl.pallas_call(
        layer1_kernel,
        out_shape=jax.ShapeDtypeStruct((n_pad, c_pad), jnp.bfloat16),
        grid=grid,
        in_specs=[pl.BlockSpec((tm, n_pad), lambda i: (i, 0)),
                  pl.BlockSpec((n_pad, h_pad), lambda i: (0, 0)),
                  pl.BlockSpec((1, h_pad), lambda i: (0, 0)),
                  pl.BlockSpec((h_pad, c_pad), lambda i: (0, 0))],
        out_specs=pl.BlockSpec((tm, c_pad), lambda i: (i, 0)),
        compiler_params=cparams,
        cost_estimate=pl.CostEstimate(
            flops=2 * n_pad * n_pad * h_pad + 2 * n_pad * h_pad * c_pad,
            transcendentals=0,
            bytes_accessed=2 * (n_pad * n_pad + n_pad * h_pad + h_pad * c_pad + n_pad * c_pad)
                           + 4 * h_pad),
    )(a, xw1, b1, w2)

    # ---- call 2: out = log_softmax(A_hat @ HW2 + b2) over real class lanes ----
    out_p = pl.pallas_call(
        layer2_kernel,
        out_shape=jax.ShapeDtypeStruct((n_pad, c_pad), jnp.float32),
        grid=grid,
        in_specs=[pl.BlockSpec((tm, n_pad), lambda i: (i, 0)),
                  pl.BlockSpec((n_pad, c_pad), lambda i: (0, 0)),
                  pl.BlockSpec((1, c_pad), lambda i: (0, 0)),
                  pl.BlockSpec((1, c_pad), lambda i: (0, 0))],
        out_specs=pl.BlockSpec((tm, c_pad), lambda i: (i, 0)),
        compiler_params=cparams,
        cost_estimate=pl.CostEstimate(
            flops=2 * n_pad * n_pad * c_pad,
            transcendentals=n_pad * c_pad + n_pad,
            bytes_accessed=2 * (n_pad * n_pad + n_pad * c_pad)
                           + 4 * (2 * c_pad + n_pad * c_pad)),
    )(a, hw2, b2, cmask)

    return out_p[:n, :num_classes]


def build_normalized_adjacency(edge_index, num_nodes):
    """Dense A_hat = D^{-1/2} (A + I) D^{-1/2}, PyG GCNConv-style normalization.

    Notes: duplicate edges are deduplicated by `.set` (PyG's sparse gcn_norm would sum
    duplicate edge weights); self-loops are written with weight 1.0 whether or not the
    edge list already contains them (matches add_remaining_self_loops with unit weights).
    """
    src, dst = edge_index[0], edge_index[1]
    a = jnp.zeros((num_nodes, num_nodes), jnp.float32)
    a = a.at[dst, src].set(1.0)                      # message flows src -> dst
    diag = jnp.arange(num_nodes)
    a = a.at[diag, diag].set(1.0)                    # self loops, weight exactly 1.0
    deg = a.sum(axis=1)
    dinv = jnp.where(deg > 0, 1.0 / jnp.sqrt(deg), 0.0)
    return dinv[:, None] * a * dinv[None, :]


def reference_forward_f32(a_hat, x, w1, b1, w2, b2):
    h = a_hat @ (x @ w1) + b1
    h = jnp.maximum(h, 0.0)
    z = a_hat @ (h @ w2) + b2
    return jax.nn.log_softmax(z, axis=1)


def reference_forward_bf16(a_hat, x, w1, b1, w2, b2):
    """Precision-matched reference: bf16 matmul operands, f32 accumulation, bf16 intermediates."""
    bf16 = jnp.bfloat16
    xw1 = jnp.dot(x.astype(bf16), w1.astype(bf16),
                  preferred_element_type=jnp.float32).astype(bf16)
    h = jnp.dot(a_hat.astype(bf16), xw1, preferred_element_type=jnp.float32) + b1
    h = jnp.maximum(h, 0.0)
    hw2 = jnp.dot(h.astype(bf16), w2.astype(bf16),
                  preferred_element_type=jnp.float32).astype(bf16)
    z = jnp.dot(a_hat.astype(bf16), hw2, preferred_element_type=jnp.float32) + b2
    return jax.nn.log_softmax(z, axis=1)


if __name__ == "__main__":
    # Small synthetic "Cora-like" problem.
    N_NODES = 64      # nodes
    N_FEATS = 64      # dataset.num_features (small synthetic)
    HIDDEN = 16       # GCNConv(features, 16)
    N_CLASSES = 8     # dataset.num_classes (small synthetic)
    N_EDGES = 256

    key = jax.random.PRNGKey(0)
    k_x, k_e, k_w1, k_w2 = jax.random.split(key, 4)

    # Node features.
    x = jax.random.normal(k_x, (N_NODES, N_FEATS), jnp.float32)

    # Random undirected edge list (2, E) — both directions included.
    e_src = jax.random.randint(k_e, (N_EDGES,), 0, N_NODES)
    e_dst = jax.random.randint(jax.random.fold_in(k_e, 1), (N_EDGES,), 0, N_NODES)
    edge_index = jnp.stack(
        [jnp.concatenate([e_src, e_dst]), jnp.concatenate([e_dst, e_src])], axis=0
    )

    a_hat = build_normalized_adjacency(edge_index, N_NODES)

    # Deterministic parameter init (Glorot-style scale for weights, zero bias).
    w1 = jax.random.normal(k_w1, (N_FEATS, HIDDEN), jnp.float32) * (1.0 / jnp.sqrt(N_FEATS))
    b1 = jnp.zeros((1, HIDDEN), jnp.float32)
    w2 = jax.random.normal(k_w2, (HIDDEN, N_CLASSES), jnp.float32) * (1.0 / jnp.sqrt(HIDDEN))
    b2 = jnp.zeros((1, N_CLASSES), jnp.float32)

    # Call-invariant pad/cast done once, off the per-forward critical path.
    params = prepare_gcn_params(a_hat, w1, b1, w2, b2)

    out = gcn_forward(params, x, num_classes=N_CLASSES)
    out = jax.block_until_ready(out)

    assert out.shape == (N_NODES, N_CLASSES)
    assert bool(jnp.all(jnp.isfinite(out)))

    # Tight check against a precision-matched (bf16 matmul / f32 accumulate) reference.
    ref_matched = reference_forward_bf16(a_hat, x, w1, b1, w2, b2)
    assert jnp.allclose(out, ref_matched, atol=2e-3, rtol=2e-3), "mismatch vs bf16-matched reference"

    # Loose sanity check against the full-f32 reference (bf16 rounding is the only difference).
    ref_f32 = reference_forward_f32(a_hat, x, w1, b1, w2, b2)
    assert jnp.allclose(out, ref_f32, atol=1e-1, rtol=1e-1), "mismatch vs f32 reference"

    print("KERNEL_OK")
</pallas_src>

<mosaic_0001>
module attributes {stable_mosaic.version = 11 : i64} {
  func.func @xw_kernel(%arg0: i32, %arg1: memref<128x128xbf16, #tpu.memory_space<vmem>>, %arg2: memref<128x128xbf16, #tpu.memory_space<vmem>>, %arg3: memref<128x128xbf16, #tpu.memory_space<vmem>>) attributes {dimension_semantics = [#tpu.dimension_semantics<parallel>], iteration_bounds = array<i64: 1>, scalar_prefetch = 0 : i64, scratch_operands = 0 : i64, tpu.core_type = #tpu.core_type<tc>, window_params = [{transform_indices = @transform_0, window_bounds = array<i64: 128, 128>}, {pipeline_mode = #tpu.pipeline_mode<synchronous>, transform_indices = @transform_1, window_bounds = array<i64: 128, 128>}, {transform_indices = @transform_2, window_bounds = array<i64: 128, 128>}]} {
    %c0 = arith.constant 0 : index
    %c0_0 = arith.constant 0 : index
    %0 = vector.load %arg1[%c0, %c0_0] : memref<128x128xbf16, #tpu.memory_space<vmem>>, vector<128x128xbf16>
    %c0_1 = arith.constant 0 : index
    %c0_2 = arith.constant 0 : index
    %1 = vector.load %arg2[%c0_1, %c0_2] : memref<128x128xbf16, #tpu.memory_space<vmem>>, vector<128x128xbf16>
    %cst = arith.constant dense<0.000000e+00> : vector<128x128xf32>
    %2 = tpu.matmul %0, %1, %cst {dimension_numbers = #tpu.dot_dimension_numbers<[1], [0], [0], [1], [0, 0, 1, 1], [], []>} : vector<128x128xbf16>, vector<128x128xbf16>, vector<128x128xf32> -> vector<128x128xf32>
    %3 = arith.truncf %2 : vector<128x128xf32> to vector<128x128xbf16>
    %c0_3 = arith.constant 0 : index
    %c0_4 = arith.constant 0 : index
    %4 = vector.load %arg3[%c0_3, %c0_4] : memref<128x128xbf16, #tpu.memory_space<vmem>>, vector<128x128xbf16>
    tpu.vector_store %arg3[%c0_3, %c0_4], %3 {strides = array<i32>} : memref<128x128xbf16, #tpu.memory_space<vmem>>, vector<128x128xbf16>,
    return
  }
  func.func @transform_0(%arg0: i32) -> (i32, i32) {
    %c0_i32 = arith.constant 0 : i32
    %c0_i32_0 = arith.constant 0 : i32
    return %arg0, %c0_i32 : i32, i32
  }
  func.func @transform_1(%arg0: i32) -> (i32, i32) {
    %c0_i32 = arith.constant 0 : i32
    %c0_i32_0 = arith.constant 0 : i32
    %c0_i32_1 = arith.constant 0 : i32
    return %c0_i32, %c0_i32_0 : i32, i32
  }
  func.func @transform_2(%arg0: i32) -> (i32, i32) {
    %c0_i32 = arith.constant 0 : i32
    %c0_i32_0 = arith.constant 0 : i32
    return %arg0, %c0_i32 : i32, i32
  }
}

module attributes {stable_mosaic.version = 11 : i64} {
  func.func @layer1_kernel(%arg0: i32, %arg1: memref<128x128xbf16, #tpu.memory_space<vmem>>, %arg2: memref<128x128xbf16, #tpu.memory_space<vmem>>, %arg3: memref<1x128xf32, #tpu.memory_space<vmem>>, %arg4: memref<128x128xbf16, #tpu.memory_space<vmem>>, %arg5: memref<128x128xbf16, #tpu.memory_space<vmem>>) attributes {dimension_semantics = [#tpu.dimension_semantics<parallel>], iteration_bounds = array<i64: 1>, scalar_prefetch = 0 : i64, scratch_operands = 0 : i64, tpu.core_type = #tpu.core_type<tc>, window_params = [{transform_indices = @transform_0, window_bounds = array<i64: 128, 128>}, {pipeline_mode = #tpu.pipeline_mode<synchronous>, transform_indices = @transform_1, window_bounds = array<i64: 128, 128>}, {pipeline_mode = #tpu.pipeline_mode<synchronous>, transform_indices = @transform_2, window_bounds = array<i64: 1, 128>}, {pipeline_mode = #tpu.pipeline_mode<synchronous>, transform_indices = @transform_3, window_bounds = array<i64: 128, 128>}, {transform_indices = @transform_4, window_bounds = array<i64: 128, 128>}]} {
    %c0 = arith.constant 0 : index
    %c0_0 = arith.constant 0 : index
    %0 = vector.load %arg1[%c0, %c0_0] : memref<128x128xbf16, #tpu.memory_space<vmem>>, vector<128x128xbf16>
    %c0_1 = arith.constant 0 : index
    %c0_2 = arith.constant 0 : index
    %1 = vector.load %arg2[%c0_1, %c0_2] : memref<128x128xbf16, #tpu.memory_space<vmem>>, vector<128x128xbf16>
    %cst = arith.constant dense<0.000000e+00> : vector<128x128xf32>
    %2 = tpu.matmul %0, %1, %cst {dimension_numbers = #tpu.dot_dimension_numbers<[1], [0], [0], [1], [0, 0, 1, 1], [], []>} : vector<128x128xbf16>, vector<128x128xbf16>, vector<128x128xf32> -> vector<128x128xf32>
    %c0_3 = arith.constant 0 : index
    %c0_4 = arith.constant 0 : index
    %3 = vector.load %arg3[%c0_3, %c0_4] : memref<1x128xf32, #tpu.memory_space<vmem>>, vector<1x128xf32>
    %4 = vector.broadcast %3 : vector<1x128xf32> to vector<128x128xf32>
    %5 = arith.addf %2, %4 : vector<128x128xf32>
    %cst_5 = arith.constant 0.000000e+00 : f32
    %6 = vector.broadcast %cst_5 : f32 to vector<128x128xf32>
    %7 = arith.maximumf %5, %6 : vector<128x128xf32>
    %8 = arith.truncf %7 : vector<128x128xf32> to vector<128x128xbf16>
    %c0_6 = arith.constant 0 : index
    %c0_7 = arith.constant 0 : index
    %9 = vector.load %arg4[%c0_6, %c0_7] : memref<128x128xbf16, #tpu.memory_space<vmem>>, vector<128x128xbf16>
    %cst_8 = arith.constant dense<0.000000e+00> : vector<128x128xf32>
    %10 = tpu.matmul %8, %9, %cst_8 {dimension_numbers = #tpu.dot_dimension_numbers<[1], [0], [0], [1], [0, 0, 1, 1], [], []>} : vector<128x128xbf16>, vector<128x128xbf16>, vector<128x128xf32> -> vector<128x128xf32>
    %11 = arith.truncf %10 : vector<128x128xf32> to vector<128x128xbf16>
    %c0_9 = arith.constant 0 : index
    %c0_10 = arith.constant 0 : index
    %12 = vector.load %arg5[%c0_9, %c0_10] : memref<128x128xbf16, #tpu.memory_space<vmem>>, vector<128x128xbf16>
    tpu.vector_store %arg5[%c0_9, %c0_10], %11 {strides = array<i32>} : memref<128x128xbf16, #tpu.memory_space<vmem>>, vector<128x128xbf16>,
    return
  }
  func.func @transform_0(%arg0: i32) -> (i32, i32) {
    %c0_i32 = arith.constant 0 : i32
    %c0_i32_0 = arith.constant 0 : i32
    return %arg0, %c0_i32 : i32, i32
  }
  func.func @transform_1(%arg0: i32) -> (i32, i32) {
    %c0_i32 = arith.constant 0 : i32
    %c0_i32_0 = arith.constant 0 : i32
    %c0_i32_1 = arith.constant 0 : i32
    return %c0_i32, %c0_i32_0 : i32, i32
  }
  func.func @transform_2(%arg0: i32) -> (i32, i32) {
    %c0_i32 = arith.constant 0 : i32
    %c0_i32_0 = arith.constant 0 : i32
    %c0_i32_1 = arith.constant 0 : i32
    return %c0_i32, %c0_i32_0 : i32, i32
  }
  func.func @transform_3(%arg0: i32) -> (i32, i32) {
    %c0_i32 = arith.constant 0 : i32
    %c0_i32_0 = arith.constant 0 : i32
    %c0_i32_1 = arith.constant 0 : i32
    return %c0_i32, %c0_i32_0 : i32, i32
  }
  func.func @transform_4(%arg0: i32) -> (i32, i32) {
    %c0_i32 = arith.constant 0 : i32
    %c0_i32_0 = arith.constant 0 : i32
    return %arg0, %c0_i32 : i32, i32
  }
}

module attributes {stable_mosaic.version = 11 : i64} {
  func.func @layer2_kernel(%arg0: i32, %arg1: memref<128x128xbf16, #tpu.memory_space<vmem>>, %arg2: memref<128x128xbf16, #tpu.memory_space<vmem>>, %arg3: memref<1x128xf32, #tpu.memory_space<vmem>>, %arg4: memref<1x128xf32, #tpu.memory_space<vmem>>, %arg5: memref<128x128xf32, #tpu.memory_space<vmem>>) attributes {dimension_semantics = [#tpu.dimension_semantics<parallel>], iteration_bounds = array<i64: 1>, scalar_prefetch = 0 : i64, scratch_operands = 0 : i64, tpu.core_type = #tpu.core_type<tc>, window_params = [{transform_indices = @transform_0, window_bounds = array<i64: 128, 128>}, {pipeline_mode = #tpu.pipeline_mode<synchronous>, transform_indices = @transform_1, window_bounds = array<i64: 128, 128>}, {pipeline_mode = #tpu.pipeline_mode<synchronous>, transform_indices = @transform_2, window_bounds = array<i64: 1, 128>}, {pipeline_mode = #tpu.pipeline_mode<synchronous>, transform_indices = @transform_3, window_bounds = array<i64: 1, 128>}, {transform_indices = @transform_4, window_bounds = array<i64: 128, 128>}]} {
    %c0 = arith.constant 0 : index
    %c0_0 = arith.constant 0 : index
    %0 = vector.load %arg1[%c0, %c0_0] : memref<128x128xbf16, #tpu.memory_space<vmem>>, vector<128x128xbf16>
    %c0_1 = arith.constant 0 : index
    %c0_2 = arith.constant 0 : index
    %1 = vector.load %arg2[%c0_1, %c0_2] : memref<128x128xbf16, #tpu.memory_space<vmem>>, vector<128x128xbf16>
    %cst = arith.constant dense<0.000000e+00> : vector<128x128xf32>
    %2 = tpu.matmul %0, %1, %cst {dimension_numbers = #tpu.dot_dimension_numbers<[1], [0], [0], [1], [0, 0, 1, 1], [], []>} : vector<128x128xbf16>, vector<128x128xbf16>, vector<128x128xf32> -> vector<128x128xf32>
    %c0_3 = arith.constant 0 : index
    %c0_4 = arith.constant 0 : index
    %3 = vector.load %arg3[%c0_3, %c0_4] : memref<1x128xf32, #tpu.memory_space<vmem>>, vector<1x128xf32>
    %4 = vector.broadcast %3 : vector<1x128xf32> to vector<128x128xf32>
    %5 = arith.addf %2, %4 : vector<128x128xf32>
    %c0_5 = arith.constant 0 : index
    %c0_6 = arith.constant 0 : index
    %6 = vector.load %arg4[%c0_5, %c0_6] : memref<1x128xf32, #tpu.memory_space<vmem>>, vector<1x128xf32>
    %7 = vector.broadcast %6 : vector<1x128xf32> to vector<128x128xf32>
    %8 = arith.addf %5, %7 : vector<128x128xf32>
    %cst_7 = arith.constant dense<0xFF800000> : vector<128xf32>
    %9 = vector.multi_reduction <maximumf>, %8, %cst_7 [1] : vector<128x128xf32> to vector<128xf32>
    %10 = vector.shape_cast %9 : vector<128xf32> to vector<128x1xf32>
    %11 = vector.broadcast %10 : vector<128x1xf32> to vector<128x128xf32>
    %12 = arith.subf %8, %11 : vector<128x128xf32>
    %13 = math.exp %12 : vector<128x128xf32>
    %cst_8 = arith.constant dense<0.000000e+00> : vector<128xf32>
    %14 = vector.multi_reduction <add>, %13, %cst_8 [1] : vector<128x128xf32> to vector<128xf32>
    %15 = vector.shape_cast %14 : vector<128xf32> to vector<128x1xf32>
    %16 = math.log %15 : vector<128x1xf32>
    %17 = vector.broadcast %16 : vector<128x1xf32> to vector<128x128xf32>
    %18 = arith.subf %12, %17 : vector<128x128xf32>
    %c0_9 = arith.constant 0 : index
    %c0_10 = arith.constant 0 : index
    %19 = vector.load %arg5[%c0_9, %c0_10] : memref<128x128xf32, #tpu.memory_space<vmem>>, vector<128x128xf32>
    tpu.vector_store %arg5[%c0_9, %c0_10], %18 {strides = array<i32>} : memref<128x128xf32, #tpu.memory_space<vmem>>, vector<128x128xf32>,
    return
  }
  func.func @transform_0(%arg0: i32) -> (i32, i32) {
    %c0_i32 = arith.constant 0 : i32
    %c0_i32_0 = arith.constant 0 : i32
    return %arg0, %c0_i32 : i32, i32
  }
  func.func @transform_1(%arg0: i32) -> (i32, i32) {
    %c0_i32 = arith.constant 0 : i32
    %c0_i32_0 = arith.constant 0 : i32
    %c0_i32_1 = arith.constant 0 : i32
    return %c0_i32, %c0_i32_0 : i32, i32
  }
  func.func @transform_2(%arg0: i32) -> (i32, i32) {
    %c0_i32 = arith.constant 0 : i32
    %c0_i32_0 = arith.constant 0 : i32
    %c0_i32_1 = arith.constant 0 : i32
    return %c0_i32, %c0_i32_0 : i32, i32
  }
  func.func @transform_3(%arg0: i32) -> (i32, i32) {
    %c0_i32 = arith.constant 0 : i32
    %c0_i32_0 = arith.constant 0 : i32
    %c0_i32_1 = arith.constant 0 : i32
    return %c0_i32, %c0_i32_0 : i32, i32
  }
  func.func @transform_4(%arg0: i32) -> (i32, i32) {
    %c0_i32 = arith.constant 0 : i32
    %c0_i32_0 = arith.constant 0 : i32
    return %arg0, %c0_i32 : i32, i32
  }
}

</mosaic_0001>

<bundles_post_ra>
// kernel: gcn_forward.3
= control target key start
LH: loop header
LB: loop body
LE: loop exit
PB: predicated region body
PF: predicated region fallthrough
CT: control target
= control target key end

     0   :  { %s583_s1 = inlined_call_operand.vmem [shape: bf16[128,128], index: 1, kind: input, shape index: {}]   ;;  %s584_s0 = inlined_call_operand.vmem [shape: bf16[128,128], index: 0, kind: input, shape index: {}]   ;;  %s585_s2 = inlined_call_operand.vmem [shape: bf16[128,128], index: 2, kind: output, shape index: {}]  }
   0x1   :  { %v480_v0 = vld [vmem:[%s583_s1] sm:$0xff]   ;;  %v481_v1 = vld [vmem:[%s583_s1 + $0x8] sm:$0xff]   ;;  %v482_v2 = vld [vmem:[%s583_s1 + $0x10] sm:$0xff]  }
   0x2   :  { %432 = vmatprep.subr.bf16.mxu0 %v480_v0  ;;  %464 = vmatprep.subr.bf16.mxu1 %v480_v0  ;;  %v483_v3 = vld [vmem:[%s583_s1 + $0x18] sm:$0xff]   ;;  %v488_v4 = vld [vmem:[%s584_s0] sm:$0xff]   ;;  %v485_v7 = vld [vmem:[%s583_s1 + $0x28] sm:$0xff]  }
   0x3   :  { %433 = vmatpush3.bf16.msra.mxu0 %v480_v0  ;;  %472 = vmatpush3.bf16.msra.mxu1 %v480_v0  ;;  %v489_v5 = vld [vmem:[%s584_s0 + $0x20] sm:$0xff]   ;;  %v486_v8 = vld [vmem:[%s583_s1 + $0x30] sm:$0xff]   ;;  %v487_v9 = vld [vmem:[%s583_s1 + $0x38] sm:$0xff]  }
   0x4   :  { %434 = vmatprep.subr.bf16.mxu0 %v481_v1  ;;  %465 = vmatprep.subr.bf16.mxu1 %v481_v1  ;;  %v484_v6 = vld [vmem:[%s583_s1 + $0x20] sm:$0xff]   ;;  %v490_v10 = vld [vmem:[%s584_s0 + $0x8] sm:$0xff]   ;;  %v492_v12 = vld [vmem:[%s584_s0 + $0x10] sm:$0xff]  }
   0x5   :  { %448 = vmatprep.mubr.bf16.mxu0 %v488_v4  ;;  %456 = vmatprep.mubr.bf16.mxu1 %v489_v5  ;;  %v491_v11 = vld [vmem:[%s584_s0 + $0x28] sm:$0xff]   ;;  %v493_v13 = vld [vmem:[%s584_s0 + $0x30] sm:$0xff]   ;;  %v494_v14 = vld [vmem:[%s584_s0 + $0x18] sm:$0xff]  }
   0x6   :  { %v495_v15 = vld [vmem:[%s584_s0 + $0x38] sm:$0xff]  }
   0x7   :  { %435 = vmatpush3.bf16.msra.mxu0 %v481_v1  ;;  %473 = vmatpush3.bf16.msra.mxu1 %v481_v1 }
   0x8   :  { %436 = vmatprep.subr.bf16.mxu0 %v482_v2  ;;  %466 = vmatprep.subr.bf16.mxu1 %v482_v2 }
   0xb   :  { %437 = vmatpush3.bf16.msra.mxu0 %v482_v2  ;;  %474 = vmatpush3.bf16.msra.mxu1 %v482_v2 }
   0xc   :  { %438 = vmatprep.subr.bf16.mxu0 %v483_v3  ;;  %467 = vmatprep.subr.bf16.mxu1 %v483_v3 }
   0xf   :  { %439 = vmatpush3.bf16.msra.mxu0 %v483_v3  ;;  %475 = vmatpush3.bf16.msra.mxu1 %v483_v3 }
  0x10   :  { %440 = vmatprep.subr.bf16.mxu0 %v484_v6  ;;  %468 = vmatprep.subr.bf16.mxu1 %v484_v6 }
  0x13   :  { %441 = vmatpush3.bf16.msra.mxu0 %v484_v6  ;;  %476 = vmatpush3.bf16.msra.mxu1 %v484_v6 }
  0x14   :  { %442 = vmatprep.subr.bf16.mxu0 %v485_v7  ;;  %469 = vmatprep.subr.bf16.mxu1 %v485_v7 }
  0x17   :  { %443 = vmatpush3.bf16.msra.mxu0 %v485_v7  ;;  %477 = vmatpush3.bf16.msra.mxu1 %v485_v7 }
  0x18   :  { %444 = vmatprep.subr.bf16.mxu0 %v486_v8  ;;  %470 = vmatprep.subr.bf16.mxu1 %v486_v8 }
  0x1b   :  { %445 = vmatpush3.bf16.msra.mxu0 %v486_v8  ;;  %478 = vmatpush3.bf16.msra.mxu1 %v486_v8 }
  0x1c   :  { %446 = vmatprep.subr.bf16.mxu0 %v487_v9  ;;  %471 = vmatprep.subr.bf16.mxu1 %v487_v9 }
  0x1f   :  { %447 = vmatpush3.bf16.msra.mxu0 %v487_v9  ;;  %479 = vmatpush3.bf16.msra.mxu1 %v487_v9 }
  0x22   :  { %449 = vmatmul.mubr.bf16.vlgmr.msra.gmra.mrb[0].mxu0 %v490_v10  ;;  %457 = vmatmul.mubr.bf16.vlgmr.msra.gmra.mrb[0].mxu1 %v491_v11 }
  0x23   :  { %452 = vmatprep.mubr.bf16.mxu0 %v492_v12  ;;  %460 = vmatprep.mubr.bf16.mxu1 %v493_v13 }
  0x2a   :  { %453 = vmatmul.mubr.bf16.gmra.mrb[4].mxu0 %v494_v14  ;;  %461 = vmatmul.mubr.bf16.gmra.mrb[4].mxu1 %v495_v15 }
  0xf5   :  { %v450_v16 = vpop.f32.mrb[0].mxu0  ;;  %v458_v17 = vpop.f32.mrb[0].mxu1 }
  0xf6   :  { %v174_v18 = vpop.f32.mrb[1].mxu0  ;;  %v206_v19 = vpop.f32.mrb[1].mxu1 }
  0xf7   :  { %v451_v20 = vpop.f32.mrb[2].mxu0  ;;  %v459_v21 = vpop.f32.mrb[2].mxu1 }
  0xf8   :  { %v377_v22 = vpack.c.bf16 %v451_v20, %v450_v16  ;;  %v397_v23 = vpack.c.bf16 %v459_v21, %v458_v17  ;;  %v177_v24 = vpop.f32.mrb[3].mxu0  ;;  %v209_v25 = vpop.f32.mrb[3].mxu1 }
  0xf9   :  { %v372_v26 = vpack.c.bf16 %v177_v24, %v174_v18  ;;  %v392_v27 = vpack.c.bf16 %v209_v25, %v206_v19 }
  0xfa   :  { %409 = vst [vmem:[%s585_s2 + $0x8] sm:$0xff] %v377_v22   ;;  %413 = vst [vmem:[%s585_s2 + $0x28] sm:$0xff] %v397_v23  }
  0xfb   :  { %373 = vst [vmem:[%s585_s2] sm:$0xff] %v372_v26   ;;  %412 = vst [vmem:[%s585_s2 + $0x20] sm:$0xff] %v392_v27  }
  0xfd   :  { %v454_v28 = vpop.f32.mrb[4].mxu0  ;;  %v462_v29 = vpop.f32.mrb[4].mxu1 }
  0xfe   :  { %v190_v30 = vpop.f32.mrb[5].mxu0  ;;  %v222_v31 = vpop.f32.mrb[5].mxu1 }
  0xff   :  { %v455_v32 = vpop.f32.mrb[6].mxu0  ;;  %v463_v33 = vpop.f32.mrb[6].mxu1 }
 0x100   :  { %v387_v34 = vpack.c.bf16 %v455_v32, %v454_v28  ;;  %v407_v35 = vpack.c.bf16 %v463_v33, %v462_v29  ;;  %v193_v36 = vpop.f32.mrb[7].mxu0  ;;  %v225_v37 = vpop.f32.mrb[7].mxu1 }
 0x101   :  { %v382_v38 = vpack.c.bf16 %v193_v36, %v190_v30  ;;  %v402_v39 = vpack.c.bf16 %v225_v37, %v222_v31 }
 0x102   :  { %411 = vst [vmem:[%s585_s2 + $0x18] sm:$0xff] %v387_v34   ;;  %415 = vst [vmem:[%s585_s2 + $0x38] sm:$0xff] %v407_v35  }
 0x103   :  { %410 = vst [vmem:[%s585_s2 + $0x10] sm:$0xff] %v382_v38   ;;  %414 = vst [vmem:[%s585_s2 + $0x30] sm:$0xff] %v402_v39  }

// kernel: gcn_forward.4
= control target key start
LH: loop header
LB: loop body
LE: loop exit
PB: predicated region body
PF: predicated region fallthrough
CT: control target
= control target key end

     0   :  { %s867_s1 = inlined_call_operand.vmem [shape: bf16[128,128], index: 1, kind: input, shape index: {}]   ;;  %s868_s0 = inlined_call_operand.vmem [shape: bf16[128,128], index: 0, kind: input, shape index: {}]   ;;  %s869_s3 = inlined_call_operand.vmem [shape: bf16[128,128], index: 3, kind: input, shape index: {}]   ;;  %s870_s2 = inlined_call_operand.vmem [shape: f32[1,128], index: 2, kind: input, shape index: {}]   ;;  %s871_s4 = inlined_call_operand.vmem [shape: bf16[128,128], index: 4, kind: output, shape index: {}]  }
   0x1   :  { %v719_v0 = vld [vmem:[%s867_s1] sm:$0xff]   ;;  %v720_v1 = vld [vmem:[%s867_s1 + $0x8] sm:$0xff]   ;;  %v721_v2 = vld [vmem:[%s867_s1 + $0x10] sm:$0xff]  }
   0x2   :  { %655 = vmatprep.subr.bf16.mxu0 %v719_v0  ;;  %v722_v3 = vld [vmem:[%s867_s1 + $0x18] sm:$0xff]   ;;  %v727_v4 = vld [vmem:[%s868_s0] sm:$0xff]   ;;  %v724_v6 = vld [vmem:[%s867_s1 + $0x28] sm:$0xff]  }
   0x3   :  { %656 = vmatpush3.bf16.msra.mxu0 %v719_v0  ;;  %671 = vmatprep.mubr.bf16.mxu0 %v727_v4  ;;  %v723_v5 = vld [vmem:[%s867_s1 + $0x20] sm:$0xff]   ;;  %v736_v8 = vld [vmem:[%s869_s3 + $0x8] sm:$0xff]   ;;  %v725_v9 = vld [vmem:[%s867_s1 + $0x30] sm:$0xff]  }
   0x4   :  { %657 = vmatprep.subr.bf16.mxu0 %v720_v1  ;;  %v735_v7 = vld [vmem:[%s869_s3] sm:$0xff]   ;;  %v737_v10 = vld [vmem:[%s869_s3 + $0x10] sm:$0xff]   ;;  %v726_v11 = vld [vmem:[%s867_s1 + $0x38] sm:$0xff]  }
   0x5   :  { %687 = vmatprep.subr.bf16.mxu1 %v735_v7  ;;  %v738_v12 = vld [vmem:[%s869_s3 + $0x18] sm:$0xff]   ;;  %v739_v13 = vld [vmem:[%s869_s3 + $0x20] sm:$0xff]   ;;  %v728_v14 = vld [vmem:[%s868_s0 + $0x8] sm:$0xff]  }
   0x6   :  { %688 = vmatpush3.bf16.msra.mxu1 %v735_v7  ;;  %v729_v15 = vld [vmem:[%s868_s0 + $0x10] sm:$0xff]   ;;  %v740_v16 = vld [vmem:[%s869_s3 + $0x28] sm:$0xff]   ;;  %v730_v17 = vld [vmem:[%s868_s0 + $0x18] sm:$0xff]  }
   0x7   :  { %658 = vmatpush3.bf16.msra.mxu0 %v720_v1  ;;  %689 = vmatprep.subr.bf16.mxu1 %v736_v8  ;;  %v731_v18 = vld [vmem:[%s868_s0 + $0x20] sm:$0xff]   ;;  %v732_v19 = vld [vmem:[%s868_s0 + $0x28] sm:$0xff]   ;;  %v733_v20 = vld [vmem:[%s868_s0 + $0x30] sm:$0xff]  }
   0x8   :  { %659 = vmatprep.subr.bf16.mxu0 %v721_v2  ;;  %v734_v21 = vld [vmem:[%s868_s0 + $0x38] sm:$0xff]   ;;  %v741_v22 = vld [vmem:[%s869_s3 + $0x30] sm:$0xff]   ;;  %v519_v24 = vld [vmem:[%s870_s2] ss:$0 sm:$0xff] }
   0x9   :  { %v742_v23 = vld [vmem:[%s869_s3 + $0x38] sm:$0xff]  }
   0xa   :  { %690 = vmatpush3.bf16.msra.mxu1 %v736_v8 }
   0xb   :  { %660 = vmatpush3.bf16.msra.mxu0 %v721_v2  ;;  %691 = vmatprep.subr.bf16.mxu1 %v737_v10 }
   0xc   :  { %661 = vmatprep.subr.bf16.mxu0 %v722_v3 }
   0xe   :  { %692 = vmatpush3.bf16.msra.mxu1 %v737_v10 }
   0xf   :  { %662 = vmatpush3.bf16.msra.mxu0 %v722_v3  ;;  %693 = vmatprep.subr.bf16.mxu1 %v738_v12 }
  0x10   :  { %663 = vmatprep.subr.bf16.mxu0 %v723_v5 }
  0x12   :  { %694 = vmatpush3.bf16.msra.mxu1 %v738_v12 }
  0x13   :  { %664 = vmatpush3.bf16.msra.mxu0 %v723_v5  ;;  %695 = vmatprep.subr.bf16.mxu1 %v739_v13 }
  0x14   :  { %665 = vmatprep.subr.bf16.mxu0 %v724_v6 }
  0x16   :  { %696 = vmatpush3.bf16.msra.mxu1 %v739_v13 }
  0x17   :  { %666 = vmatpush3.bf16.msra.mxu0 %v724_v6  ;;  %697 = vmatprep.subr.bf16.mxu1 %v740_v16 }
  0x18   :  { %667 = vmatprep.subr.bf16.mxu0 %v725_v9 }
  0x1a   :  { %698 = vmatpush3.bf16.msra.mxu1 %v740_v16 }
  0x1b   :  { %668 = vmatpush3.bf16.msra.mxu0 %v725_v9  ;;  %699 = vmatprep.subr.bf16.mxu1 %v741_v22 }
  0x1c   :  { %669 = vmatprep.subr.bf16.mxu0 %v726_v11 }
  0x1e   :  { %700 = vmatpush3.bf16.msra.mxu1 %v741_v22 }
  0x1f   :  { %670 = vmatpush3.bf16.msra.mxu0 %v726_v11  ;;  %701 = vmatprep.subr.bf16.mxu1 %v742_v23 }
  0x22   :  { %672 = vmatmul.mubr.bf16.vlgmr.msra.gmra.mrb[0].mxu0 %v728_v14  ;;  %702 = vmatpush3.bf16.msra.mxu1 %v742_v23 }
  0x23   :  { %675 = vmatprep.mubr.bf16.mxu0 %v729_v15 }
  0x2a   :  { %676 = vmatmul.mubr.bf16.gmra.mrb[4].mxu0 %v730_v17 }
  0x2b   :  { %679 = vmatprep.mubr.bf16.mxu0 %v731_v18 }
  0x32   :  { %680 = vmatmul.mubr.bf16.gmra.mrb[8].mxu0 %v732_v19 }
  0x33   :  { %683 = vmatprep.mubr.bf16.mxu0 %v733_v20 }
  0x3a   :  { %684 = vmatmul.mubr.bf16.gmra.mrb[12].mxu0 %v734_v21 }
  0xf5   :  { %v673_v25 = vpop.f32.mrb[0].mxu0 }
  0xf6   :  { %v196_v26 = vadd.f32 %v673_v25, %v519_v24  ;;  %v187_v27 = vpop.f32.mrb[1].mxu0 }
  0xf7   :  { %v188_v28 = vadd.f32 %v519_v24, %v187_v27  ;;  %v674_v29 = vpop.f32.mrb[2].mxu0 }
  0xf8   :  { %v199_v30 = vadd.f32 %v674_v29, %v519_v24  ;;  %v190_v31 = vpop.f32.mrb[3].mxu0  ;;  %v252_v33 = vmax.f32 %v196_v26, 0.0 }
  0xf9   :  { %v191_v32 = vadd.f32 %v519_v24, %v190_v31  ;;  %v250_v35 = vmax.f32 %v188_v28, 0.0 }
  0xfa   :  { %v253_v34 = vmax.f32 %v199_v30, 0.0 }
  0xfb   :  { %v251_v36 = vmax.f32 %v191_v32, 0.0 }
  0xfc   :  { %v267_v37 = vpack.c.bf16 %v253_v34, %v252_v33 }
  0xfd   :  { %v677_v38 = vpop.f32.mrb[4].mxu0  ;;  %v266_v39 = vpack.c.bf16 %v251_v36, %v250_v35 }
  0xfe   :  { %v212_v40 = vadd.f32 %v677_v38, %v519_v24  ;;  %v203_v41 = vpop.f32.mrb[5].mxu0 }
  0xff   :  { %v204_v42 = vadd.f32 %v519_v24, %v203_v41  ;;  %v678_v43 = vpop.f32.mrb[6].mxu0  ;;  %703 = vmatprep.mubr.bf16.mxu1 %v266_v39 }
 0x100   :  { %v215_v44 = vadd.f32 %v678_v43, %v519_v24  ;;  %v206_v45 = vpop.f32.mrb[7].mxu0  ;;  %704 = vmatmul.mubr.bf16.vlgmr.msra.gmra.mrb[0].mxu1 %v267_v37  ;;  %v256_v47 = vmax.f32 %v212_v40, 0.0 }
 0x101   :  { %v207_v46 = vadd.f32 %v519_v24, %v206_v45  ;;  %v254_v49 = vmax.f32 %v204_v42, 0.0 }
 0x102   :  { %v257_v48 = vmax.f32 %v215_v44, 0.0 }
 0x103   :  { %v255_v50 = vmax.f32 %v207_v46, 0.0 }
 0x104   :  { %v269_v51 = vpack.c.bf16 %v257_v48, %v256_v47 }
 0x105   :  { %v268_v52 = vpack.c.bf16 %v255_v50, %v254_v49  ;;  %v681_v53 = vpop.f32.mrb[8].mxu0 }
 0x106   :  { %v228_v54 = vadd.f32 %v681_v53, %v519_v24  ;;  %v219_v55 = vpop.f32.mrb[9].mxu0 }
 0x107   :  { %v220_v56 = vadd.f32 %v519_v24, %v219_v55  ;;  %v682_v57 = vpop.f32.mrb[10].mxu0  ;;  %707 = vmatprep.mubr.bf16.mxu1 %v268_v52 }
 0x108   :  { %v231_v58 = vadd.f32 %v682_v57, %v519_v24  ;;  %v222_v59 = vpop.f32.mrb[11].mxu0  ;;  %708 = vmatmul.mubr.bf16.gmra.mrb[4].mxu1 %v269_v51  ;;  %v260_v61 = vmax.f32 %v228_v54, 0.0 }
 0x109   :  { %v223_v60 = vadd.f32 %v519_v24, %v222_v59  ;;  %v258_v63 = vmax.f32 %v220_v56, 0.0 }
 0x10a   :  { %v261_v62 = vmax.f32 %v231_v58, 0.0 }
 0x10b   :  { %v259_v0 = vmax.f32 %v223_v60, 0.0 }
 0x10c   :  { %v271_v1 = vpack.c.bf16 %v261_v62, %v260_v61 }
 0x10d   :  { %v270_v2 = vpack.c.bf16 %v259_v0, %v258_v63  ;;  %v685_v3 = vpop.f32.mrb[12].mxu0 }
 0x10e   :  { %v244_v4 = vadd.f32 %v685_v3, %v519_v24  ;;  %v235_v5 = vpop.f32.mrb[13].mxu0 }
 0x10f   :  { %v236_v6 = vadd.f32 %v519_v24, %v235_v5  ;;  %v686_v7 = vpop.f32.mrb[14].mxu0  ;;  %711 = vmatprep.mubr.bf16.mxu1 %v270_v2 }
 0x110   :  { %v247_v8 = vadd.f32 %v686_v7, %v519_v24  ;;  %v238_v9 = vpop.f32.mrb[15].mxu0  ;;  %712 = vmatmul.mubr.bf16.gmra.mrb[8].mxu1 %v271_v1  ;;  %v264_v11 = vmax.f32 %v244_v4, 0.0 }
 0x111   :  { %v239_v10 = vadd.f32 %v519_v24, %v238_v9  ;;  %v262_v13 = vmax.f32 %v236_v6, 0.0 }
 0x112   :  { %v265_v12 = vmax.f32 %v247_v8, 0.0 }
 0x113   :  { %v263_v14 = vmax.f32 %v239_v10, 0.0 }
 0x114   :  { %v273_v15 = vpack.c.bf16 %v265_v12, %v264_v11 }
 0x115   :  { %v272_v16 = vpack.c.bf16 %v263_v14, %v262_v13 }
 0x117   :  { %715 = vmatprep.mubr.bf16.mxu1 %v272_v16 }
 0x118   :  { %716 = vmatmul.mubr.bf16.gmra.mrb[12].mxu1 %v273_v15 }
 0x1d3   :  { %v705_v17 = vpop.f32.mrb[0].mxu1 }
 0x1d4   :  { %v372_v18 = vpop.f32.mrb[1].mxu1 }
 0x1d5   :  { %v706_v19 = vpop.f32.mrb[2].mxu1 }
 0x1d6   :  { %v584_v20 = vpack.c.bf16 %v706_v19, %v705_v17  ;;  %v375_v21 = vpop.f32.mrb[3].mxu1 }
 0x1d7   :  { %v579_v22 = vpack.c.bf16 %v375_v21, %v372_v18 }
 0x1d8   :  { %616 = vst [vmem:[%s871_s4 + $0x8] sm:$0xff] %v584_v20  }
 0x1d9   :  { %580 = vst [vmem:[%s871_s4] sm:$0xff] %v579_v22  }
 0x1db   :  { %v709_v23 = vpop.f32.mrb[4].mxu1 }
 0x1dc   :  { %v388_v24 = vpop.f32.mrb[5].mxu1 }
 0x1dd   :  { %v710_v25 = vpop.f32.mrb[6].mxu1 }
 0x1de   :  { %v594_v26 = vpack.c.bf16 %v710_v25, %v709_v23  ;;  %v391_v27 = vpop.f32.mrb[7].mxu1 }
 0x1df   :  { %v589_v28 = vpack.c.bf16 %v391_v27, %v388_v24 }
 0x1e0   :  { %618 = vst [vmem:[%s871_s4 + $0x18] sm:$0xff] %v594_v26  }
 0x1e1   :  { %617 = vst [vmem:[%s871_s4 + $0x10] sm:$0xff] %v589_v28  }
 0x1e3   :  { %v713_v29 = vpop.f32.mrb[8].mxu1 }
 0x1e4   :  { %v404_v30 = vpop.f32.mrb[9].mxu1 }
 0x1e5   :  { %v714_v31 = vpop.f32.mrb[10].mxu1 }
 0x1e6   :  { %v604_v32 = vpack.c.bf16 %v714_v31, %v713_v29  ;;  %v407_v33 = vpop.f32.mrb[11].mxu1 }
 0x1e7   :  { %v599_v34 = vpack.c.bf16 %v407_v33, %v404_v30 }
 0x1e8   :  { %620 = vst [vmem:[%s871_s4 + $0x28] sm:$0xff] %v604_v32  }
 0x1e9   :  { %619 = vst [vmem:[%s871_s4 + $0x20] sm:$0xff] %v599_v34  }
 0x1eb   :  { %v717_v35 = vpop.f32.mrb[12].mxu1 }
 0x1ec   :  { %v420_v36 = vpop.f32.mrb[13].mxu1 }
 0x1ed   :  { %v718_v37 = vpop.f32.mrb[14].mxu1 }
 0x1ee   :  { %v614_v38 = vpack.c.bf16 %v718_v37, %v717_v35  ;;  %v423_v39 = vpop.f32.mrb[15].mxu1 }
 0x1ef   :  { %v609_v40 = vpack.c.bf16 %v423_v39, %v420_v36 }
 0x1f0   :  { %622 = vst [vmem:[%s871_s4 + $0x38] sm:$0xff] %v614_v38  }
 0x1f1   :  { %621 = vst [vmem:[%s871_s4 + $0x30] sm:$0xff] %v609_v40  }

// kernel: gcn_forward.5
= control target key start
LH: loop header
LB: loop body
LE: loop exit
PB: predicated region body
PF: predicated region fallthrough
CT: control target
= control target key end

     0   :  { %s822_s1 = inlined_call_operand.vmem [shape: bf16[128,128], index: 1, kind: input, shape index: {}]   ;;  %s823_s0 = inlined_call_operand.vmem [shape: bf16[128,128], index: 0, kind: input, shape index: {}]   ;;  %s824_s2 = inlined_call_operand.vmem [shape: f32[1,128], index: 2, kind: input, shape index: {}]   ;;  %s825_s3 = inlined_call_operand.vmem [shape: f32[1,128], index: 3, kind: input, shape index: {}]   ;;  %s826_s4 = inlined_call_operand.vmem [shape: f32[128,128], index: 4, kind: output, shape index: {}]  }
   0x1   :  { %v535_v0 = vld [vmem:[%s822_s1] sm:$0xff]   ;;  %v536_v1 = vld [vmem:[%s822_s1 + $0x8] sm:$0xff]   ;;  %v537_v2 = vld [vmem:[%s822_s1 + $0x10] sm:$0xff]  }
   0x2   :  { %487 = vmatprep.subr.bf16.mxu0 %v535_v0  ;;  %519 = vmatprep.subr.bf16.mxu1 %v535_v0  ;;  %v538_v3 = vld [vmem:[%s822_s1 + $0x18] sm:$0xff]   ;;  %v543_v4 = vld [vmem:[%s823_s0] sm:$0xff]   ;;  %v540_v7 = vld [vmem:[%s822_s1 + $0x28] sm:$0xff]  }
   0x3   :  { %488 = vmatpush3.bf16.msra.mxu0 %v535_v0  ;;  %527 = vmatpush3.bf16.msra.mxu1 %v535_v0  ;;  %v544_v5 = vld [vmem:[%s823_s0 + $0x20] sm:$0xff]   ;;  %v541_v8 = vld [vmem:[%s822_s1 + $0x30] sm:$0xff]   ;;  %v542_v9 = vld [vmem:[%s822_s1 + $0x38] sm:$0xff]  }
   0x4   :  { %489 = vmatprep.subr.bf16.mxu0 %v536_v1  ;;  %520 = vmatprep.subr.bf16.mxu1 %v536_v1  ;;  %v539_v6 = vld [vmem:[%s822_s1 + $0x20] sm:$0xff]   ;;  %v545_v10 = vld [vmem:[%s823_s0 + $0x8] sm:$0xff]   ;;  %v547_v12 = vld [vmem:[%s823_s0 + $0x10] sm:$0xff]  }
   0x5   :  { %503 = vmatprep.mubr.bf16.mxu0 %v543_v4  ;;  %511 = vmatprep.mubr.bf16.mxu1 %v544_v5  ;;  %v546_v11 = vld [vmem:[%s823_s0 + $0x28] sm:$0xff]   ;;  %v549_v13 = vld [vmem:[%s823_s0 + $0x30] sm:$0xff]   ;;  %v548_v14 = vld [vmem:[%s823_s0 + $0x18] sm:$0xff]  }
   0x6   :  { %v550_v15 = vld [vmem:[%s823_s0 + $0x38] sm:$0xff]   ;;  %v453_v16 = vld [vmem:[%s824_s2] ss:$0 sm:$0xff] }
   0x7   :  { %490 = vmatpush3.bf16.msra.mxu0 %v536_v1  ;;  %528 = vmatpush3.bf16.msra.mxu1 %v536_v1  ;;  %v470_v19 = vld [vmem:[%s825_s3] ss:$0 sm:$0xff] }
   0x8   :  { %491 = vmatprep.subr.bf16.mxu0 %v537_v2  ;;  %521 = vmatprep.subr.bf16.mxu1 %v537_v2 }
   0xb   :  { %492 = vmatpush3.bf16.msra.mxu0 %v537_v2  ;;  %529 = vmatpush3.bf16.msra.mxu1 %v537_v2 }
   0xc   :  { %493 = vmatprep.subr.bf16.mxu0 %v538_v3  ;;  %522 = vmatprep.subr.bf16.mxu1 %v538_v3 }
   0xf   :  { %494 = vmatpush3.bf16.msra.mxu0 %v538_v3  ;;  %530 = vmatpush3.bf16.msra.mxu1 %v538_v3 }
  0x10   :  { %495 = vmatprep.subr.bf16.mxu0 %v539_v6  ;;  %523 = vmatprep.subr.bf16.mxu1 %v539_v6 }
  0x13   :  { %496 = vmatpush3.bf16.msra.mxu0 %v539_v6  ;;  %531 = vmatpush3.bf16.msra.mxu1 %v539_v6 }
  0x14   :  { %497 = vmatprep.subr.bf16.mxu0 %v540_v7  ;;  %524 = vmatprep.subr.bf16.mxu1 %v540_v7 }
  0x17   :  { %498 = vmatpush3.bf16.msra.mxu0 %v540_v7  ;;  %532 = vmatpush3.bf16.msra.mxu1 %v540_v7 }
  0x18   :  { %499 = vmatprep.subr.bf16.mxu0 %v541_v8  ;;  %525 = vmatprep.subr.bf16.mxu1 %v541_v8 }
  0x1b   :  { %500 = vmatpush3.bf16.msra.mxu0 %v541_v8  ;;  %533 = vmatpush3.bf16.msra.mxu1 %v541_v8 }
  0x1c   :  { %501 = vmatprep.subr.bf16.mxu0 %v542_v9  ;;  %526 = vmatprep.subr.bf16.mxu1 %v542_v9 }
  0x1f   :  { %502 = vmatpush3.bf16.msra.mxu0 %v542_v9  ;;  %534 = vmatpush3.bf16.msra.mxu1 %v542_v9 }
  0x22   :  { %504 = vmatmul.mubr.bf16.vlgmr.msra.gmra.mrb[0].mxu0 %v545_v10  ;;  %512 = vmatmul.mubr.bf16.vlgmr.msra.gmra.mrb[0].mxu1 %v546_v11 }
  0x23   :  { %507 = vmatprep.mubr.bf16.mxu0 %v547_v12  ;;  %515 = vmatprep.mubr.bf16.mxu1 %v549_v13 }
  0x2a   :  { %508 = vmatmul.mubr.bf16.gmra.mrb[4].mxu0 %v548_v14  ;;  %516 = vmatmul.mubr.bf16.gmra.mrb[4].mxu1 %v550_v15 }
  0xf5   :  { %v505_v17 = vpop.f32.mrb[0].mxu0  ;;  %v513_v18 = vpop.f32.mrb[0].mxu1 }
  0xf6   :  { %v196_v20 = vadd.f32 %v505_v17, %v453_v16  ;;  %v228_v21 = vadd.f32 %v513_v18, %v453_v16  ;;  %v187_v22 = vpop.f32.mrb[1].mxu0  ;;  %v219_v23 = vpop.f32.mrb[1].mxu1 }
  0xf7   :  { %v506_v24 = vpop.f32.mrb[2].mxu0  ;;  %v514_v25 = vpop.f32.mrb[2].mxu1  ;;  %v188_v26 = vadd.f32 %v453_v16, %v187_v22  ;;  %v220_v32 = vadd.f32 %v453_v16, %v219_v23 }
  0xf8   :  { %v199_v27 = vadd.f32 %v506_v24, %v453_v16  ;;  %v190_v28 = vpop.f32.mrb[3].mxu0  ;;  %v222_v29 = vpop.f32.mrb[3].mxu1  ;;  %v267_v30 = vadd.f32 %v470_v19, %v228_v21  ;;  %v259_v31 = vadd.f32 %v470_v19, %v196_v20  ;;  %v231_v33 = vadd.f32 %v514_v25, %v453_v16 }
  0xf9   :  { %v257_v35 = vadd.f32 %v470_v19, %v188_v26  ;;  %v191_v42 = vadd.f32 %v453_v16, %v190_v28  ;;  %v223_v43 = vadd.f32 %v453_v16, %v222_v29  ;;  %v265_v45 = vadd.f32 %v470_v19, %v220_v32 }
  0xfa   :  { %293 = vmax.xlane.f32.xlu0 %v267_v30  ;;  %277 = vmax.xlane.f32.xlu1 %v259_v31  ;;  %v260_v34 = vadd.f32 %v470_v19, %v199_v27  ;;  %v268_v44 = vadd.f32 %v470_v19, %v231_v33 }
  0xfb   :  { %v266_v50 = vadd.f32 %v470_v19, %v223_v43  ;;  %v258_v51 = vadd.f32 %v470_v19, %v191_v42 }
  0xfd   :  { %v509_v36 = vpop.f32.mrb[4].mxu0  ;;  %v517_v37 = vpop.f32.mrb[4].mxu1 }
  0xfe   :  { %279 = vmax.xlane.f32.xlu1 %v260_v34  ;;  %273 = vmax.xlane.f32.xlu0 %v257_v35  ;;  %v203_v38 = vpop.f32.mrb[5].mxu0  ;;  %v235_v39 = vpop.f32.mrb[5].mxu1  ;;  %v212_v48 = vadd.f32 %v509_v36, %v453_v16  ;;  %v244_v62 = vadd.f32 %v517_v37, %v453_v16 }
  0xff   :  { %v510_v40 = vpop.f32.mrb[6].mxu0  ;;  %v518_v41 = vpop.f32.mrb[6].mxu1  ;;  %v204_v54 = vadd.f32 %v453_v16, %v203_v38  ;;  %v236_v56 = vadd.f32 %v453_v16, %v235_v39 }
 0x100   :  { %v206_v46 = vpop.f32.mrb[7].mxu0  ;;  %v238_v47 = vpop.f32.mrb[7].mxu1  ;;  %v215_v49 = vadd.f32 %v510_v40, %v453_v16  ;;  %v263_v53 = vadd.f32 %v470_v19, %v212_v48  ;;  %v247_v63 = vadd.f32 %v518_v41, %v453_v16  ;;  %v702_v1 = vadd.f32 %v470_v19, %v244_v62 }
 0x101   :  { %v207_v55 = vadd.f32 %v453_v16, %v206_v46  ;;  %v239_v57 = vadd.f32 %v453_v16, %v238_v47  ;;  %v261_v59 = vadd.f32 %v470_v19, %v204_v54  ;;  %v696_v61 = vadd.f32 %v470_v19, %v236_v56 }
 0x102   :  { %295 = vmax.xlane.f32.xlu1 %v268_v44  ;;  %289 = vmax.xlane.f32.xlu0 %v265_v45  ;;  %v264_v52 = vadd.f32 %v470_v19, %v215_v49  ;;  %v700_v0 = vadd.f32 %v470_v19, %v247_v63 }
 0x103   :  { %v262_v58 = vadd.f32 %v470_v19, %v207_v55  ;;  %v694_v60 = vadd.f32 %v470_v19, %v239_v57 }
 0x106   :  { %291 = vmax.xlane.f32.xlu1 %v266_v50  ;;  %275 = vmax.xlane.f32.xlu0 %v258_v51 }
 0x10a   :  { %287 = vmax.xlane.f32.xlu1 %v264_v52  ;;  %285 = vmax.xlane.f32.xlu0 %v263_v53 }
 0x10e   :  { %283 = vmax.xlane.f32.xlu1 %v262_v58  ;;  %281 = vmax.xlane.f32.xlu0 %v261_v59 }
 0x112   :  { %299 = vmax.xlane.f32.xlu1 %v694_v60  ;;  %297 = vmax.xlane.f32.xlu0 %v696_v61 }
 0x116   :  { %303 = vmax.xlane.f32.xlu1 %v700_v0  ;;  %301 = vmax.xlane.f32.xlu0 %v702_v1 }
 0x187   :  { %v294_v2 = vpop.xlane.xlu0 %293  ;;  %v278_v3 = vpop.xlane.xlu1 %277 }
 0x188   :  { %v706_v4 = vsub.f32 %v259_v31, %v278_v3  ;;  %v708_v5 = vsub.f32 %v267_v30, %v294_v2 }
 0x18a   :  { %v325_v6 = vmul.f32 1.442695, %v706_v4  ;;  %v341_v10 = vmul.f32 1.442695, %v708_v5 }
 0x18b   :  { %v280_v7 = vpop.xlane.xlu1 %279  ;;  %v274_v8 = vpop.xlane.xlu0 %273 }
 0x18c   :  { %v711_v9 = vsub.f32 %v260_v34, %v280_v7  ;;  %551 = vpow2.f32 %v325_v6  ;;  %v714_v11 = vsub.f32 %v257_v35, %v274_v8 }
 0x18e   :  { %v327_v12 = vmul.f32 1.442695, %v711_v9  ;;  %v321_v17 = vmul.f32 1.442695, %v714_v11 }
 0x18f   :  { %v296_v13 = vpop.xlane.xlu1 %295  ;;  %v290_v14 = vpop.xlane.xlu0 %289 }
 0x190   :  { %553 = vpow2.f32 %v327_v12  ;;  %v717_v15 = vsub.f32 %v268_v44, %v296_v13  ;;  %v719_v16 = vsub.f32 %v265_v45, %v290_v14 }
 0x191   :  { %555 = vpow2.f32 %v341_v10 }
 0x192   :  { %v343_v18 = vmul.f32 1.442695, %v717_v15  ;;  %v337_v21 = vmul.f32 1.442695, %v719_v16 }
 0x193   :  { %v292_v19 = vpop.xlane.xlu1 %291  ;;  %v276_v20 = vpop.xlane.xlu0 %275 }
 0x194   :  { %557 = vpow2.f32 %v343_v18  ;;  %v724_v22 = vsub.f32 %v266_v50, %v292_v19  ;;  %v726_v23 = vsub.f32 %v258_v51, %v276_v20 }
 0x195   :  { %559 = vpow2.f32 %v321_v17 }
 0x196   :  { %v323_v24 = vmul.f32 1.442695, %v726_v23  ;;  %v552_v25 = vpop.eup %551  ;;  %561 = vpow2.f32 %v337_v21  ;;  %v339_v28 = vmul.f32 1.442695, %v724_v22 }
 0x197   :  { %v288_v26 = vpop.xlane.xlu1 %287  ;;  %v286_v27 = vpop.xlane.xlu0 %285  ;;  %357 = vadd.xlane.f32.xlu0 %v552_v25 }
 0x198   :  { %v730_v29 = vsub.f32 %v264_v52, %v288_v26  ;;  %v732_v30 = vsub.f32 %v263_v53, %v286_v27  ;;  %563 = vpow2.f32 %v323_v24 }
 0x199   :  { %565 = vpow2.f32 %v339_v28 }
 0x19a   :  { %v554_v31 = vpop.eup %553  ;;  %v333_v32 = vmul.f32 1.442695, %v732_v30  ;;  %v335_v36 = vmul.f32 1.442695, %v730_v29 }
 0x19b   :  { %v556_v33 = vpop.eup %555  ;;  %359 = vadd.xlane.f32.xlu1 %v554_v31  ;;  %v284_v34 = vpop.xlane.xlu1 %283 }
 0x19c   :  { %v282_v35 = vpop.xlane.xlu0 %281  ;;  %v736_v37 = vsub.f32 %v262_v58, %v284_v34  ;;  %373 = vadd.xlane.f32.xlu0 %v556_v33  ;;  %567 = vpow2.f32 %v333_v32 }
 0x19d   :  { %v738_v38 = vsub.f32 %v261_v59, %v282_v35  ;;  %569 = vpow2.f32 %v335_v36 }
 0x19e   :  { %v558_v39 = vpop.eup %557  ;;  %v331_v44 = vmul.f32 1.442695, %v736_v37 }
 0x19f   :  { %v329_v40 = vmul.f32 1.442695, %v738_v38  ;;  %v560_v41 = vpop.eup %559  ;;  %375 = vadd.xlane.f32.xlu1 %v558_v39  ;;  %v300_v42 = vpop.xlane.xlu1 %299 }
 0x1a0   :  { %v298_v43 = vpop.xlane.xlu0 %297  ;;  %v743_v45 = vsub.f32 %v694_v60, %v300_v42  ;;  %353 = vadd.xlane.f32.xlu0 %v560_v41  ;;  %v562_v47 = vpop.eup %561 }
 0x1a1   :  { %v746_v46 = vsub.f32 %v696_v61, %v298_v43  ;;  %571 = vpow2.f32 %v329_v40 }
 0x1a2   :  { %v564_v49 = vpop.eup %563  ;;  %573 = vpow2.f32 %v331_v44  ;;  %v347_v52 = vmul.f32 1.442695, %v743_v45 }
 0x1a3   :  { %v345_v48 = vmul.f32 1.442695, %v746_v46  ;;  %v304_v50 = vpop.xlane.xlu1 %303  ;;  %355 = vadd.xlane.f32.xlu1 %v564_v49  ;;  %v566_v55 = vpop.eup %565 }
 0x1a4   :  { %v302_v51 = vpop.xlane.xlu0 %301  ;;  %369 = vadd.xlane.f32.xlu0 %v562_v47  ;;  %v754_v54 = vsub.f32 %v700_v0, %v304_v50 }
 0x1a5   :  { %v751_v53 = vsub.f32 %v702_v1, %v302_v51  ;;  %575 = vpow2.f32 %v345_v48 }
 0x1a6   :  { %v568_v57 = vpop.eup %567  ;;  %577 = vpow2.f32 %v347_v52  ;;  %v351_v58 = vmul.f32 1.442695, %v754_v54 }
 0x1a7   :  { %v349_v56 = vmul.f32 1.442695, %v751_v53  ;;  %371 = vadd.xlane.f32.xlu1 %v566_v55  ;;  %v570_v59 = vpop.eup %569 }
 0x1a8   :  { %365 = vadd.xlane.f32.xlu0 %v568_v57 }
 0x1a9   :  { %579 = vpow2.f32 %v349_v56 }
 0x1aa   :  { %581 = vpow2.f32 %v351_v58 }
 0x1ab   :  { %v572_v60 = vpop.eup %571  ;;  %367 = vadd.xlane.f32.xlu1 %v570_v59 }
 0x1ac   :  { %361 = vadd.xlane.f32.xlu0 %v572_v60  ;;  %v574_v61 = vpop.eup %573 }
 0x1af   :  { %v576_v62 = vpop.eup %575  ;;  %363 = vadd.xlane.f32.xlu1 %v574_v61 }
 0x1b0   :  { %377 = vadd.xlane.f32.xlu0 %v576_v62  ;;  %v578_v63 = vpop.eup %577 }
 0x1b3   :  { %v580_v0 = vpop.eup %579  ;;  %379 = vadd.xlane.f32.xlu1 %v578_v63 }
 0x1b4   :  { %381 = vadd.xlane.f32.xlu0 %v580_v0  ;;  %v582_v1 = vpop.eup %581 }
 0x1b7   :  { %383 = vadd.xlane.f32.xlu1 %v582_v1 }
 0x224   :  { %v358_v2 = vpop.xlane.xlu0 %357 }
 0x225   :  { %583 = vlog2.f32 %v358_v2 }
 0x228   :  { %v360_v3 = vpop.xlane.xlu1 %359 }
 0x229   :  { %585 = vlog2.f32 %v360_v3  ;;  %v374_v6 = vpop.xlane.xlu0 %373 }
 0x22a   :  { %587 = vlog2.f32 %v374_v6 }
 0x22c   :  { %v376_v7 = vpop.xlane.xlu1 %375 }
 0x22d   :  { %589 = vlog2.f32 %v376_v7  ;;  %v354_v8 = vpop.xlane.xlu0 %353 }
 0x22e   :  { %591 = vlog2.f32 %v354_v8 }
 0x22f   :  { %v584_v10 = vpop.eup %583 }
 0x230   :  { %v390_v12 = vmul.f32 0.6931472, %v584_v10  ;;  %v356_v13 = vpop.xlane.xlu1 %355 }
 0x231   :  { %v370_v14 = vpop.xlane.xlu0 %369  ;;  %593 = vlog2.f32 %v356_v13 }
 0x232   :  { %v419_v18 = vsub.f32 %v706_v4, %v390_v12  ;;  %595 = vlog2.f32 %v370_v14 }
 0x233   :  { %v586_v17 = vpop.eup %585 }
 0x234   :  { %v588_v19 = vpop.eup %587  ;;  %v392_v20 = vmul.f32 0.6931472, %v586_v17  ;;  %435 = vst [vmem:[%s826_s4 + $0x10] sm:$0xff] %v419_v18  ;;  %v372_v24 = vpop.xlane.xlu1 %371 }
 0x235   :  { %v406_v21 = vmul.f32 0.6931472, %v588_v19  ;;  %v366_v25 = vpop.xlane.xlu0 %365  ;;  %597 = vlog2.f32 %v372_v24 }
 0x236   :  { %v420_v26 = vsub.f32 %v711_v9, %v392_v20  ;;  %599 = vlog2.f32 %v366_v25 }
 0x237   :  { %v590_v27 = vpop.eup %589  ;;  %v427_v28 = vsub.f32 %v708_v5, %v406_v21 }
 0x238   :  { %v592_v31 = vpop.eup %591  ;;  %436 = vst [vmem:[%s826_s4 + $0x18] sm:$0xff] %v420_v26  ;;  %v408_v4 = vmul.f32 0.6931472, %v590_v27  ;;  %v368_v33 = vpop.xlane.xlu1 %367 }
 0x239   :  { %443 = vst [vmem:[%s826_s4 + $0x50] sm:$0xff] %v427_v28  ;;  %v386_v32 = vmul.f32 0.6931472, %v592_v31  ;;  %v362_v34 = vpop.xlane.xlu0 %361  ;;  %601 = vlog2.f32 %v368_v33 }
 0x23a   :  { %v428_v9 = vsub.f32 %v717_v15, %v408_v4  ;;  %603 = vlog2.f32 %v362_v34 }
 0x23b   :  { %v417_v35 = vsub.f32 %v714_v11, %v386_v32  ;;  %v594_v5 = vpop.eup %593 }
 0x23c   :  { %444 = vst [vmem:[%s826_s4 + $0x58] sm:$0xff] %v428_v9  ;;  %v596_v36 = vpop.eup %595  ;;  %v388_v39 = vmul.f32 0.6931472, %v594_v5  ;;  %v364_v40 = vpop.xlane.xlu1 %363 }
 0x23d   :  { %433 = vst [vmem:[%s826_s4] sm:$0xff] %v417_v35  ;;  %v378_v41 = vpop.xlane.xlu0 %377  ;;  %v402_v42 = vmul.f32 0.6931472, %v596_v36  ;;  %605 = vlog2.f32 %v364_v40 }
 0x23e   :  { %v418_v15 = vsub.f32 %v726_v23, %v388_v39  ;;  %607 = vlog2.f32 %v378_v41 }
 0x23f   :  { %v598_v11 = vpop.eup %597  ;;  %v425_v43 = vsub.f32 %v719_v16, %v402_v42 }
 0x240   :  { %v600_v44 = vpop.eup %599  ;;  %434 = vst [vmem:[%s826_s4 + $0x8] sm:$0xff] %v418_v15  ;;  %v404_v47 = vmul.f32 0.6931472, %v598_v11  ;;  %v380_v48 = vpop.xlane.xlu1 %379 }
 0x241   :  { %v382_v49 = vpop.xlane.xlu0 %381  ;;  %441 = vst [vmem:[%s826_s4 + $0x40] sm:$0xff] %v425_v43  ;;  %v398_v50 = vmul.f32 0.6931472, %v600_v44  ;;  %609 = vlog2.f32 %v380_v48 }
 0x242   :  { %v426_v23 = vsub.f32 %v724_v22, %v404_v47  ;;  %611 = vlog2.f32 %v382_v49 }
 0x243   :  { %v602_v51 = vpop.eup %601  ;;  %v423_v16 = vsub.f32 %v732_v30, %v398_v50 }
 0x244   :  { %v604_v52 = vpop.eup %603  ;;  %442 = vst [vmem:[%s826_s4 + $0x48] sm:$0xff] %v426_v23  ;;  %v400_v55 = vmul.f32 0.6931472, %v602_v51  ;;  %v384_v56 = vpop.xlane.xlu1 %383 }
 0x245   :  { %439 = vst [vmem:[%s826_s4 + $0x30] sm:$0xff] %v423_v16  ;;  %v394_v57 = vmul.f32 0.6931472, %v604_v52  ;;  %613 = vlog2.f32 %v384_v56 }
 0x246   :  { %v424_v58 = vsub.f32 %v730_v29, %v400_v55 }
 0x247   :  { %v606_v22 = vpop.eup %605  ;;  %v421_v59 = vsub.f32 %v738_v38, %v394_v57 }
 0x248   :  { %v608_v60 = vpop.eup %607  ;;  %440 = vst [vmem:[%s826_s4 + $0x38] sm:$0xff] %v424_v58  ;;  %v396_v30 = vmul.f32 0.6931472, %v606_v22 }
 0x249   :  { %437 = vst [vmem:[%s826_s4 + $0x20] sm:$0xff] %v421_v59  ;;  %v410_v61 = vmul.f32 0.6931472, %v608_v60 }
 0x24a   :  { %v422_v62 = vsub.f32 %v736_v37, %v396_v30 }
 0x24b   :  { %v610_v63 = vpop.eup %609  ;;  %v429_v0 = vsub.f32 %v746_v46, %v410_v61 }
 0x24c   :  { %v612_v29 = vpop.eup %611  ;;  %438 = vst [vmem:[%s826_s4 + $0x28] sm:$0xff] %v422_v62  ;;  %v412_v38 = vmul.f32 0.6931472, %v610_v63 }
 0x24d   :  { %445 = vst [vmem:[%s826_s4 + $0x60] sm:$0xff] %v429_v0  ;;  %v414_v1 = vmul.f32 0.6931472, %v612_v29 }
 0x24e   :  { %v430_v2 = vsub.f32 %v743_v45, %v412_v38 }
 0x24f   :  { %v614_v3 = vpop.eup %613  ;;  %v431_v6 = vsub.f32 %v751_v53, %v414_v1 }
 0x250   :  { %446 = vst [vmem:[%s826_s4 + $0x68] sm:$0xff] %v430_v2  ;;  %v416_v37 = vmul.f32 0.6931472, %v614_v3 }
 0x251   :  { %447 = vst [vmem:[%s826_s4 + $0x70] sm:$0xff] %v431_v6 }
 0x252   :  { %v432_v46 = vsub.f32 %v754_v54, %v416_v37 }
 0x254   :  { %448 = vst [vmem:[%s826_s4 + $0x78] sm:$0xff] %v432_v46 }

</bundles_post_ra>
